<compile_context>
chip_gen: v6e
topology: v6e:2x2x1
jax: 0.10.0
libtpu: 0.0.40
codegen_flags: <defaults>
</compile_context>

<pallas_src>
import jax
import jax.numpy as jnp
from jax.experimental import pallas as pl
from jax.experimental.pallas import tpu as pltpu


def _mlp_kernel(x_ref, w1_ref, b1_ref, w2_ref, b2_ref, w3_ref, b3_ref,
                w4_ref, b4_ref, o_ref):
    bf16 = w1_ref.dtype
    f32 = jnp.float32

    # fc1: [TB, D](bf16) @ [D, H](bf16) -> f32, bias in f32
    h = jnp.dot(x_ref[...], w1_ref[...], preferred_element_type=f32)
    h = h + b1_ref[...]

    # block: Linear -> ReLU -> Linear (bf16 operands, f32 accumulate/activations)
    h = jnp.dot(h.astype(bf16), w2_ref[...], preferred_element_type=f32)
    h = jnp.maximum(h + b2_ref[...], 0.0)
    h = jnp.dot(h.astype(bf16), w3_ref[...], preferred_element_type=f32)
    h = h + b3_ref[...]

    # fc2 (out_features == 1): contract the (1, H) weight row against h's
    # hidden dim -> result laid out (1, TB), batch on lanes (lane-dense store).
    logits = jax.lax.dot_general(
        w4_ref[...], h.astype(bf16),
        dimension_numbers=(((1,), (1,)), ((), ())),
        preferred_element_type=f32)
    logits = logits + b4_ref[...]

    # sigmoid: exp lands on the EUP slot
    o_ref[...] = jax.nn.sigmoid(logits).astype(o_ref.dtype)


def simple_model_forward(x, params, *, batch_tile=128):
    """x: [B, input_dim] float32 -> [B, 1] float32."""
    w1, b1, w2, b2, w3, b3, w4, b4 = params
    B, D = x.shape
    H = w1.shape[1]
    H4 = w2.shape[1]

    TB = batch_tile
    num_tiles = pl.cdiv(B, TB)
    B_pad = num_tiles * TB
    if B_pad != B:
        x = jnp.pad(x, ((0, B_pad - B), (0, 0)))

    # bf16 matmul operands (MXU-native on v6e/v7x, halves DMA bytes);
    # biases stay f32.
    xb = x.astype(jnp.bfloat16)
    w1b, w2b, w3b, w4b = (w.astype(jnp.bfloat16) for w in (w1, w2, w3, w4))

    def resident(shape):
        # whole array as one block, same block every grid step -> loaded once
        return pl.BlockSpec(shape, lambda i, _s=shape: tuple(0 for _ in _s))

    flops = 2 * B_pad * (D * H + H * H4 + H4 * H + H)
    bytes_accessed = (
        xb.size * 2
        + sum(w.size * 2 for w in (w1b, w2b, w3b, w4b))
        + sum(b.size * 4 for b in (b1, b2, b3, b4))
        + B_pad * 4)

    out = pl.pallas_call(
        _mlp_kernel,
        out_shape=jax.ShapeDtypeStruct((1, B_pad), jnp.float32),
        grid=(num_tiles,),
        in_specs=[
            pl.BlockSpec((TB, D), lambda i: (i, 0)),   # x: tiled over batch
            resident(w1b.shape), resident(b1.shape),
            resident(w2b.shape), resident(b2.shape),
            resident(w3b.shape), resident(b3.shape),
            resident(w4b.shape), resident(b4.shape),
        ],
        # lane-dense output: batch on lanes, one (1, TB) block per grid step
        out_specs=pl.BlockSpec((1, TB), lambda i: (0, i)),
        compiler_params=pltpu.CompilerParams(
            dimension_semantics=("parallel",)),
        cost_estimate=pl.CostEstimate(
            flops=flops, transcendentals=B_pad, bytes_accessed=bytes_accessed),
    )(xb, w1b, b1, w2b, b2, w3b, b3, w4b, b4)

    return out[0, :B, None]


def init_linear(key, fan_in, fan_out, *, as_row=False):
    """PyTorch nn.Linear default init: U(-1/sqrt(fan_in), 1/sqrt(fan_in)).

    Weight returned as [fan_in, fan_out] for x @ W (or as the PyTorch
    [fan_out, fan_in] row when as_row=True, used for the width-1 fc2).
    Bias returned 2D for TPU layout friendliness.
    """
    kw, kb = jax.random.split(key)
    bound = 1.0 / jnp.sqrt(jnp.float32(fan_in))
    if as_row:
        w = jax.random.uniform(kw, (fan_out, fan_in), jnp.float32, -bound, bound)
    else:
        w = jax.random.uniform(kw, (fan_in, fan_out), jnp.float32, -bound, bound)
    b = jax.random.uniform(kb, (1, fan_out), jnp.float32, -bound, bound)
    return w, b


def make_params(key, input_dim, hidden_size=32):
    k1, k2, k3, k4 = jax.random.split(key, 4)
    w1, b1 = init_linear(k1, input_dim, hidden_size)              # fc1
    w2, b2 = init_linear(k2, hidden_size, hidden_size * 4)        # block[0]
    w3, b3 = init_linear(k3, hidden_size * 4, hidden_size)        # block[2]
    w4, b4 = init_linear(k4, hidden_size, 1, as_row=True)         # fc2: (1, H)
    return (w1, b1, w2, b2, w3, b3, w4, b4)


def reference_forward(x, params):
    """Pure-JAX reference mirroring the kernel's bf16-operand / f32-accum math."""
    w1, b1, w2, b2, w3, b3, w4, b4 = params
    bf16, f32 = jnp.bfloat16, jnp.float32

    def dot(a, w):
        return jnp.dot(a.astype(bf16), w.astype(bf16), preferred_element_type=f32)

    h = dot(x, w1) + b1
    h = jnp.maximum(dot(h, w2) + b2, 0.0)
    h = dot(h, w3) + b3
    logits = dot(h, w4.T) + b4.reshape(1, 1)
    return jax.nn.sigmoid(logits)


if __name__ == "__main__":
    batch = 8
    input_dim = 16
    hidden_size = 32

    key = jax.random.PRNGKey(0)
    kx, kp = jax.random.split(key)
    x = jax.random.normal(kx, (batch, input_dim), jnp.float32)
    params = make_params(kp, input_dim, hidden_size)

    out = simple_model_forward(x, params)
    out = jax.block_until_ready(out)

    ref = reference_forward(x, params)
    assert out.shape == (batch, 1), out.shape
    assert jnp.allclose(out, ref, atol=2e-5, rtol=2e-5), (
        f"max abs err {jnp.max(jnp.abs(out - ref))}")

    print("KERNEL_OK")
</pallas_src>

<mosaic_0001>
module attributes {stable_mosaic.version = 11 : i64} {
  func.func @_mlp_kernel(%arg0: i32, %arg1: memref<128x16xbf16, #tpu.memory_space<vmem>>, %arg2: memref<16x32xbf16, #tpu.memory_space<vmem>>, %arg3: memref<1x32xf32, #tpu.memory_space<vmem>>, %arg4: memref<32x128xbf16, #tpu.memory_space<vmem>>, %arg5: memref<1x128xf32, #tpu.memory_space<vmem>>, %arg6: memref<128x32xbf16, #tpu.memory_space<vmem>>, %arg7: memref<1x32xf32, #tpu.memory_space<vmem>>, %arg8: memref<1x32xbf16, #tpu.memory_space<vmem>>, %arg9: memref<1x1xf32, #tpu.memory_space<vmem>>, %arg10: memref<1x128xf32, #tpu.memory_space<vmem>>) attributes {dimension_semantics = [#tpu.dimension_semantics<parallel>], iteration_bounds = array<i64: 1>, scalar_prefetch = 0 : i64, scratch_operands = 0 : i64, tpu.core_type = #tpu.core_type<tc>, window_params = [{transform_indices = @transform_0, window_bounds = array<i64: 128, 16>}, {pipeline_mode = #tpu.pipeline_mode<synchronous>, transform_indices = @transform_1, window_bounds = array<i64: 16, 32>}, {pipeline_mode = #tpu.pipeline_mode<synchronous>, transform_indices = @transform_2, window_bounds = array<i64: 1, 32>}, {pipeline_mode = #tpu.pipeline_mode<synchronous>, transform_indices = @transform_3, window_bounds = array<i64: 32, 128>}, {pipeline_mode = #tpu.pipeline_mode<synchronous>, transform_indices = @transform_4, window_bounds = array<i64: 1, 128>}, {pipeline_mode = #tpu.pipeline_mode<synchronous>, transform_indices = @transform_5, window_bounds = array<i64: 128, 32>}, {pipeline_mode = #tpu.pipeline_mode<synchronous>, transform_indices = @transform_6, window_bounds = array<i64: 1, 32>}, {pipeline_mode = #tpu.pipeline_mode<synchronous>, transform_indices = @transform_7, window_bounds = array<i64: 1, 32>}, {pipeline_mode = #tpu.pipeline_mode<synchronous>, transform_indices = @transform_8, window_bounds = array<i64: 1, 1>}, {transform_indices = @transform_9, window_bounds = array<i64: 1, 128>}]} {
    %c0 = arith.constant 0 : index
    %c0_0 = arith.constant 0 : index
    %0 = vector.load %arg1[%c0, %c0_0] : memref<128x16xbf16, #tpu.memory_space<vmem>>, vector<128x16xbf16>
    %c0_1 = arith.constant 0 : index
    %c0_2 = arith.constant 0 : index
    %1 = vector.load %arg2[%c0_1, %c0_2] : memref<16x32xbf16, #tpu.memory_space<vmem>>, vector<16x32xbf16>
    %cst = arith.constant dense<0.000000e+00> : vector<128x32xf32>
    %2 = tpu.matmul %0, %1, %cst {dimension_numbers = #tpu.dot_dimension_numbers<[1], [0], [0], [1], [0, 0, 1, 1], [], []>} : vector<128x16xbf16>, vector<16x32xbf16>, vector<128x32xf32> -> vector<128x32xf32>
    %c0_3 = arith.constant 0 : index
    %c0_4 = arith.constant 0 : index
    %3 = vector.load %arg3[%c0_3, %c0_4] : memref<1x32xf32, #tpu.memory_space<vmem>>, vector<1x32xf32>
    %4 = vector.broadcast %3 : vector<1x32xf32> to vector<128x32xf32>
    %5 = arith.addf %2, %4 : vector<128x32xf32>
    %6 = arith.truncf %5 : vector<128x32xf32> to vector<128x32xbf16>
    %c0_5 = arith.constant 0 : index
    %c0_6 = arith.constant 0 : index
    %7 = vector.load %arg4[%c0_5, %c0_6] : memref<32x128xbf16, #tpu.memory_space<vmem>>, vector<32x128xbf16>
    %cst_7 = arith.constant dense<0.000000e+00> : vector<128x128xf32>
    %8 = tpu.matmul %6, %7, %cst_7 {dimension_numbers = #tpu.dot_dimension_numbers<[1], [0], [0], [1], [0, 0, 1, 1], [], []>} : vector<128x32xbf16>, vector<32x128xbf16>, vector<128x128xf32> -> vector<128x128xf32>
    %c0_8 = arith.constant 0 : index
    %c0_9 = arith.constant 0 : index
    %9 = vector.load %arg5[%c0_8, %c0_9] : memref<1x128xf32, #tpu.memory_space<vmem>>, vector<1x128xf32>
    %10 = vector.broadcast %9 : vector<1x128xf32> to vector<128x128xf32>
    %11 = arith.addf %8, %10 : vector<128x128xf32>
    %cst_10 = arith.constant 0.000000e+00 : f32
    %12 = vector.broadcast %cst_10 : f32 to vector<128x128xf32>
    %13 = arith.maximumf %11, %12 : vector<128x128xf32>
    %14 = arith.truncf %13 : vector<128x128xf32> to vector<128x128xbf16>
    %c0_11 = arith.constant 0 : index
    %c0_12 = arith.constant 0 : index
    %15 = vector.load %arg6[%c0_11, %c0_12] : memref<128x32xbf16, #tpu.memory_space<vmem>>, vector<128x32xbf16>
    %cst_13 = arith.constant dense<0.000000e+00> : vector<128x32xf32>
    %16 = tpu.matmul %14, %15, %cst_13 {dimension_numbers = #tpu.dot_dimension_numbers<[1], [0], [0], [1], [0, 0, 1, 1], [], []>} : vector<128x128xbf16>, vector<128x32xbf16>, vector<128x32xf32> -> vector<128x32xf32>
    %c0_14 = arith.constant 0 : index
    %c0_15 = arith.constant 0 : index
    %17 = vector.load %arg7[%c0_14, %c0_15] : memref<1x32xf32, #tpu.memory_space<vmem>>, vector<1x32xf32>
    %18 = vector.broadcast %17 : vector<1x32xf32> to vector<128x32xf32>
    %19 = arith.addf %16, %18 : vector<128x32xf32>
    %c0_16 = arith.constant 0 : index
    %c0_17 = arith.constant 0 : index
    %20 = vector.load %arg8[%c0_16, %c0_17] : memref<1x32xbf16, #tpu.memory_space<vmem>>, vector<1x32xbf16>
    %21 = arith.truncf %19 : vector<128x32xf32> to vector<128x32xbf16>
    %cst_18 = arith.constant dense<0.000000e+00> : vector<1x128xf32>
    %22 = tpu.matmul %20, %21, %cst_18 {dimension_numbers = #tpu.dot_dimension_numbers<[1], [1], [0], [0], [0, 0, 1, 0], [], []>} : vector<1x32xbf16>, vector<128x32xbf16>, vector<1x128xf32> -> vector<1x128xf32>
    %c0_19 = arith.constant 0 : index
    %c0_20 = arith.constant 0 : index
    %23 = vector.load %arg9[%c0_19, %c0_20] : memref<1x1xf32, #tpu.memory_space<vmem>>, vector<1x1xf32>
    %24 = vector.broadcast %23 : vector<1x1xf32> to vector<1x128xf32>
    %25 = arith.addf %22, %24 : vector<1x128xf32>
    %26 = arith.negf %25 : vector<1x128xf32>
    %27 = math.exp %26 : vector<1x128xf32>
    %cst_21 = arith.constant 1.000000e+00 : f32
    %28 = vector.broadcast %cst_21 : f32 to vector<1x128xf32>
    %29 = arith.addf %28, %27 : vector<1x128xf32>
    %30 = arith.divf %28, %29 : vector<1x128xf32>
    %c0_22 = arith.constant 0 : index
    %c0_23 = arith.constant 0 : index
    %31 = vector.load %arg10[%c0_22, %c0_23] : memref<1x128xf32, #tpu.memory_space<vmem>>, vector<1x128xf32>
    tpu.vector_store %arg10[%c0_22, %c0_23], %30 {strides = array<i32>} : memref<1x128xf32, #tpu.memory_space<vmem>>, vector<1x128xf32>,
    return
  }
  func.func @transform_0(%arg0: i32) -> (i32, i32) {
    %c0_i32 = arith.constant 0 : i32
    %c0_i32_0 = arith.constant 0 : i32
    return %arg0, %c0_i32 : i32, i32
  }
  func.func @transform_1(%arg0: i32) -> (i32, i32) {
    %c0_i32 = arith.constant 0 : i32
    %c0_i32_0 = arith.constant 0 : i32
    %c0_i32_1 = arith.constant 0 : i32
    return %c0_i32, %c0_i32_0 : i32, i32
  }
  func.func @transform_2(%arg0: i32) -> (i32, i32) {
    %c0_i32 = arith.constant 0 : i32
    %c0_i32_0 = arith.constant 0 : i32
    %c0_i32_1 = arith.constant 0 : i32
    return %c0_i32, %c0_i32_0 : i32, i32
  }
  func.func @transform_3(%arg0: i32) -> (i32, i32) {
    %c0_i32 = arith.constant 0 : i32
    %c0_i32_0 = arith.constant 0 : i32
    %c0_i32_1 = arith.constant 0 : i32
    return %c0_i32, %c0_i32_0 : i32, i32
  }
  func.func @transform_4(%arg0: i32) -> (i32, i32) {
    %c0_i32 = arith.constant 0 : i32
    %c0_i32_0 = arith.constant 0 : i32
    %c0_i32_1 = arith.constant 0 : i32
    return %c0_i32, %c0_i32_0 : i32, i32
  }
  func.func @transform_5(%arg0: i32) -> (i32, i32) {
    %c0_i32 = arith.constant 0 : i32
    %c0_i32_0 = arith.constant 0 : i32
    %c0_i32_1 = arith.constant 0 : i32
    return %c0_i32, %c0_i32_0 : i32, i32
  }
  func.func @transform_6(%arg0: i32) -> (i32, i32) {
    %c0_i32 = arith.constant 0 : i32
    %c0_i32_0 = arith.constant 0 : i32
    %c0_i32_1 = arith.constant 0 : i32
    return %c0_i32, %c0_i32_0 : i32, i32
  }
  func.func @transform_7(%arg0: i32) -> (i32, i32) {
    %c0_i32 = arith.constant 0 : i32
    %c0_i32_0 = arith.constant 0 : i32
    %c0_i32_1 = arith.constant 0 : i32
    return %c0_i32, %c0_i32_0 : i32, i32
  }
  func.func @transform_8(%arg0: i32) -> (i32, i32) {
    %c0_i32 = arith.constant 0 : i32
    %c0_i32_0 = arith.constant 0 : i32
    %c0_i32_1 = arith.constant 0 : i32
    return %c0_i32, %c0_i32_0 : i32, i32
  }
  func.func @transform_9(%arg0: i32) -> (i32, i32) {
    %c0_i32 = arith.constant 0 : i32
    %c0_i32_0 = arith.constant 0 : i32
    return %c0_i32, %arg0 : i32, i32
  }
}

</mosaic_0001>

<bundles_post_ra>
// kernel: tpu_custom_call.1
= control target key start
LH: loop header
LB: loop body
LE: loop exit
PB: predicated region body
PF: predicated region fallthrough
CT: control target
= control target key end

     0   :  { %s1068_s0 = inlined_call_operand.vmem [shape: bf16[128,16], index: 0, kind: input, shape index: {}]   ;;  %s1069_s1 = inlined_call_operand.vmem [shape: bf16[16,32], index: 1, kind: input, shape index: {}]   ;;  %s1070_s2 = inlined_call_operand.vmem [shape: f32[1,32], index: 2, kind: input, shape index: {}]   ;;  %s1071_s3 = inlined_call_operand.vmem [shape: bf16[32,128], index: 3, kind: input, shape index: {}]   ;;  %s1072_s4 = inlined_call_operand.vmem [shape: f32[1,128], index: 4, kind: input, shape index: {}]   ;;  %s1073_s5 = inlined_call_operand.vmem [shape: bf16[128,32], index: 5, kind: input, shape index: {}]   ;;  %s1074_s6 = inlined_call_operand.vmem [shape: f32[1,32], index: 6, kind: input, shape index: {}]   ;;  %s1075_s7 = inlined_call_operand.vmem [shape: bf16[1,32], index: 7, kind: input, shape index: {}]   ;;  %s1076_s8 = inlined_call_operand.<no memory space> [shape: f32[1,1], index: 8, kind: input, shape index: {}]   ;;  %s1077_s9 = inlined_call_operand.hbm [shape: f32[1,128], index: 9, kind: output, shape index: {}]  }
   0x1   :  { %v14_v0 = vstv %s1076_s8 }
   0x2   :  { %15 = vst [vmem:[#allocation2] sm:$0x1] %v14_v0 }
   0x3   :  { %v860_v1 = vld [vmem:[%s1069_s1] sm:$0xff]   ;;  %vm107_vm0 = vcmask 130048   ;;  %v862_v3 = vld [vmem:[%s1068_s0 + $0x8] sm:$0xff]   ;;  %v863_v4 = vld [vmem:[%s1068_s0 + $0x10] sm:$0xff]  }
   0x4   :  { %v861_v2 = vld [vmem:[%s1068_s0] sm:$0xff]   ;;  %765 = vmatprep.subr.bf16.mxu0 %v860_v1  ;;  %v864_v5 = vld [vmem:[%s1068_s0 + $0x18] sm:$0xff]  }
   0x5   :  { %766 = vmatpush3.bf16.msra.mxu0 %v860_v1  ;;  %767 = vmatprep.mubr.msk.bf16.mxu0 %vm107_vm0, %v861_v2  ;;  %v865_v6 = vld [vmem:[%s1068_s0 + $0x20] sm:$0xff]  }
   0x8   :  { %768 = vmatmul.mubr.msk.bf16.vlgmr.msra.gmra.mxu0 %vm107_vm0, %v862_v3 }
   0x9   :  { %771 = vmatprep.mubr.msk.bf16.mxu0 %vm107_vm0, %v863_v4 }
  0x10   :  { %772 = vmatmul.mubr.msk.bf16.gmra.mxu0 %vm107_vm0, %v864_v5 }
  0x11   :  { %775 = vmatprep.mubr.msk.bf16.mxu0 %vm107_vm0, %v865_v6 }
  0x12   :  { %16 = vsyncpa [#allocation4], 0  ;;  %v866_v7 = vld [vmem:[%s1068_s0 + $0x28] sm:$0xff]   ;;  %v867_v8 = vld [vmem:[%s1068_s0 + $0x30] sm:$0xff]   ;;  %vm260_vm1 = vcmask 261120   ;;  %vm906_vm2 = vmmov 0  }
  0x13   :  { %v868_v9 = vld [vmem:[%s1068_s0 + $0x38] sm:$0xff]   ;;  %v869_v10 = vld [vmem:[%s1071_s3 + $0x8] sm:$0xff]   ;;  %v870_v11 = vld [vmem:[%s1071_s3] sm:$0xff]   ;;  %s908_s26 = smov [#allocation3]  }
  0x14   :  { %783 = vmatprep.subr.bf16.mxu1 %v869_v10  ;;  %v871_v12 = vld [vmem:[%s1073_s5 + $0x38] sm:$0xff]   ;;  %v872_v13 = vld [vmem:[%s1073_s5 + $0x30] sm:$0xff]   ;;  %v873_v14 = vld [vmem:[%s1073_s5 + $0x28] sm:$0xff]   ;;  %s673_s27 = sshll.u32 %s908_s26, 4  ;;  %s674_s27 = int_to_ptr.vmem [resolvable:$true] %s673_s27 }
  0x15   :  { %784 = vmatpush3.bf16.msra.mxu1 %v869_v10  ;;  %803 = vmatprep.subr.bf16.mxu0 %v871_v12  ;;  %v874_v15 = vld [vmem:[%s1073_s5 + $0x20] sm:$0xff]   ;;  %v875_v16 = vld [vmem:[%s1073_s5 + $0x18] sm:$0xff]   ;;  %v876_v58 = vld [vmem:[%s1073_s5 + $0x10] sm:$0xff]   ;;  %s887_s28 = scalar_lea.vmem %s674_s27, 32  ;;  %p888_p1 = scmp.lt.s32.totalorder %s674_s27, %s674_s27 }
  0x16   :  { %785 = vmatprep.subr.bf16.mxu1 %v870_v11  ;;  %804 = vmatpush3.bf16.msra.mxu0 %v871_v12  ;;  %v681_v20 = vld [vmem:[%s1070_s2] ss:$0 sm:$0xff]  ;;  %v877_v59 = vld [vmem:[%s1073_s5 + $0x8] sm:$0xff]  }
  0x17   :  { %805 = vmatprep.subr.bf16.mxu0 %v872_v13  ;;  %v878_v60 = vld [vmem:[%s1073_s5] sm:$0xff]  }
  0x18   :  { %776 = vmatmul.mubr.msk.bf16.gmra.mxu0 %vm107_vm0, %v866_v7  ;;  %v699_v63 = vld [vmem:[%s1072_s4] ss:$0 sm:$0xff] }
  0x19   :  { %779 = vmatprep.mubr.msk.bf16.mxu0 %vm107_vm0, %v867_v8  ;;  %786 = vmatpush3.bf16.msra.mxu1 %v870_v11 }
  0x1a   :  { %806 = vmatpush3.bf16.msra.mxu0 %v872_v13 }
  0x1b   :  { %807 = vmatprep.subr.bf16.mxu0 %v873_v14 }
  0x1e   :  { %808 = vmatpush3.bf16.msra.mxu0 %v873_v14 }
  0x1f   :  { %809 = vmatprep.subr.bf16.mxu0 %v874_v15 }
  0x20   :  { %780 = vmatmul.mubr.msk.bf16.gmra.mxu0 %vm107_vm0, %v868_v9 }
  0x22   :  { %810 = vmatpush3.bf16.msra.mxu0 %v874_v15 }
  0x23   :  { %811 = vmatprep.subr.bf16.mxu0 %v875_v16 }
  0x26   :  { %812 = vmatpush3.bf16.msra.mxu0 %v875_v16 }
  0x27   :  { %813 = vmatprep.subr.bf16.mxu0 %v876_v58 }
  0x2a   :  { %814 = vmatpush3.bf16.msra.mxu0 %v876_v58  ;;  %v710_v58 = vld [vmem:[%s1074_s6] ss:$0 sm:$0xff] }
  0x2b   :  { %815 = vmatprep.subr.bf16.mxu0 %v877_v59 }
  0x2e   :  { %816 = vmatpush3.bf16.msra.mxu0 %v877_v59 }
  0x2f   :  { %817 = vmatprep.subr.bf16.mxu0 %v878_v60 }
  0x32   :  { %818 = vmatpush3.bf16.msra.mxu0 %v878_v60 }
  0xc8   :  { %v769_v17 = vpop.f32.mrf.mxu0 }
  0xc9   :  { %v175_v25 = vadd.f32 %v769_v17, %v681_v20 }
  0xca   :  { %v166_v18 = vpop.f32.mrf.mxu0 }
  0xcb   :  { %v167_v23 = vadd.f32 %v681_v20, %v166_v18 }
  0xcc   :  { %v770_v19 = vpop.f32.mrf.mxu0 }
  0xcd   :  { %v178_v21 = vadd.f32 %v770_v19, %v681_v20 }
  0xce   :  { %v169_v22 = vpop.f32.mrf.mxu0 }
  0xcf   :  { %v170_v24 = vadd.f32 %v681_v20, %v169_v22  ;;  %v230_v28 = vpack.c.bf16 %v178_v21, %v175_v25 }
  0xd0   :  { %v773_v26 = vpop.f32.mrf.mxu0 }
  0xd1   :  { %v229_v27 = vpack.c.bf16 %v170_v24, %v167_v23  ;;  %v191_v35 = vadd.f32 %v773_v26, %v681_v20 }
  0xd2   :  { %v182_v29 = vpop.f32.mrf.mxu0 }
  0xd3   :  { %787 = vmatprep.mubr.msk.bf16.mxu1 %vm260_vm1, %v229_v27  ;;  %v183_v33 = vadd.f32 %v681_v20, %v182_v29 }
  0xd4   :  { %v774_v30 = vpop.f32.mrf.mxu0  ;;  %788 = vmatmul.mubr.msk.bf16.vlgmr.msra.gmra.mxu1 %vm260_vm1, %v230_v28 }
  0xd5   :  { %v194_v31 = vadd.f32 %v774_v30, %v681_v20 }
  0xd6   :  { %v185_v32 = vpop.f32.mrf.mxu0 }
  0xd7   :  { %v186_v34 = vadd.f32 %v681_v20, %v185_v32  ;;  %v232_v38 = vpack.c.bf16 %v194_v31, %v191_v35 }
  0xd8   :  { %v777_v36 = vpop.f32.mrf.mxu0 }
  0xd9   :  { %v231_v37 = vpack.c.bf16 %v186_v34, %v183_v33  ;;  %v207_v45 = vadd.f32 %v777_v36, %v681_v20 }
  0xda   :  { %v198_v39 = vpop.f32.mrf.mxu0 }
  0xdb   :  { %791 = vmatprep.mubr.msk.bf16.mxu1 %vm260_vm1, %v231_v37  ;;  %v199_v43 = vadd.f32 %v681_v20, %v198_v39 }
  0xdc   :  { %v778_v40 = vpop.f32.mrf.mxu0  ;;  %792 = vmatmul.mubr.msk.bf16.gmra.mxu1 %vm260_vm1, %v232_v38 }
  0xdd   :  { %v210_v41 = vadd.f32 %v778_v40, %v681_v20 }
  0xde   :  { %v201_v42 = vpop.f32.mrf.mxu0 }
  0xdf   :  { %v202_v44 = vadd.f32 %v681_v20, %v201_v42  ;;  %v234_v48 = vpack.c.bf16 %v210_v41, %v207_v45 }
  0xe0   :  { %v781_v46 = vpop.f32.mrf.mxu0 }
  0xe1   :  { %v233_v47 = vpack.c.bf16 %v202_v44, %v199_v43  ;;  %v223_v55 = vadd.f32 %v781_v46, %v681_v20 }
  0xe2   :  { %v214_v49 = vpop.f32.mrf.mxu0 }
  0xe3   :  { %795 = vmatprep.mubr.msk.bf16.mxu1 %vm260_vm1, %v233_v47  ;;  %v215_v53 = vadd.f32 %v681_v20, %v214_v49 }
  0xe4   :  { %v782_v50 = vpop.f32.mrf.mxu0  ;;  %796 = vmatmul.mubr.msk.bf16.gmra.mxu1 %vm260_vm1, %v234_v48 }
  0xe5   :  { %v226_v51 = vadd.f32 %v782_v50, %v681_v20 }
  0xe6   :  { %v217_v52 = vpop.f32.mrf.mxu0 }
  0xe7   :  { %v218_v54 = vadd.f32 %v681_v20, %v217_v52  ;;  %v236_v57 = vpack.c.bf16 %v226_v51, %v223_v55  ;;  %v583_v55 = vld [vmem:[#allocation2] sm:$0x1] }
  0xe9   :  { %v235_v56 = vpack.c.bf16 %v218_v54, %v215_v53  ;;  %v905_v54 = vmov 0.0  }
  0xea   :  { %835 = vmatprep.subr.bf16.mxu1 %v905_v54 }
  0xeb   :  { %799 = vmatprep.mubr.msk.bf16.mxu1 %vm260_vm1, %v235_v56  ;;  %v907_v56 = vmov 0  }
  0xec   :  { %800 = vmatmul.mubr.msk.bf16.gmra.mxu1 %vm260_vm1, %v236_v57  ;;  %859 = vset.pattern.permute.xlu0 %v907_v56 }
  0xed   :  { %851 = vmatprep.mubr.msk.bf16.mxu1 %vm906_vm2, %v905_v54  ;;  %586 = vperm.xlu0 %859, %v583_v55  }
 0x194   :  { %v789_v61 = vpop.f32.mrf.mxu1 }
 0x195   :  { %v328_v3 = vadd.f32 %v789_v61, %v699_v63 }
 0x196   :  { %v319_v62 = vpop.f32.mrf.mxu1 }
 0x197   :  { %v320_v1 = vadd.f32 %v699_v63, %v319_v62  ;;  %v384_v10 = vmax.f32 %v328_v3, 0.0 }
 0x198   :  { %v790_v0 = vpop.f32.mrf.mxu1 }
 0x199   :  { %v331_v2 = vadd.f32 %v790_v0, %v699_v63  ;;  %v382_v8 = vmax.f32 %v320_v1, 0.0 }
 0x19a   :  { %v322_v4 = vpop.f32.mrf.mxu1 }
 0x19b   :  { %v323_v5 = vadd.f32 %v699_v63, %v322_v4  ;;  %v385_v6 = vmax.f32 %v331_v2, 0.0 }
 0x19c   :  { %v793_v7 = vpop.f32.mrf.mxu1 }
 0x19d   :  { %v383_v9 = vmax.f32 %v323_v5, 0.0  ;;  %v399_v13 = vpack.c.bf16 %v385_v6, %v384_v10  ;;  %v344_v17 = vadd.f32 %v793_v7, %v699_v63 }
 0x19e   :  { %v335_v11 = vpop.f32.mrf.mxu1 }
 0x19f   :  { %v398_v12 = vpack.c.bf16 %v383_v9, %v382_v8  ;;  %v336_v15 = vadd.f32 %v699_v63, %v335_v11  ;;  %v388_v24 = vmax.f32 %v344_v17, 0.0 }
 0x1a0   :  { %v794_v14 = vpop.f32.mrf.mxu1 }
 0x1a1   :  { %v347_v16 = vadd.f32 %v794_v14, %v699_v63  ;;  %819 = vmatprep.mubr.bf16.mxu0 %v398_v12  ;;  %v386_v22 = vmax.f32 %v336_v15, 0.0 }
 0x1a2   :  { %v338_v18 = vpop.f32.mrf.mxu1  ;;  %820 = vmatmul.mubr.bf16.vlgmr.msra.gmra.mxu0 %v399_v13 }
 0x1a3   :  { %v339_v19 = vadd.f32 %v699_v63, %v338_v18  ;;  %v389_v20 = vmax.f32 %v347_v16, 0.0 }
 0x1a4   :  { %v797_v21 = vpop.f32.mrf.mxu1 }
 0x1a5   :  { %v387_v23 = vmax.f32 %v339_v19, 0.0  ;;  %v401_v27 = vpack.c.bf16 %v389_v20, %v388_v24  ;;  %v360_v31 = vadd.f32 %v797_v21, %v699_v63 }
 0x1a6   :  { %v351_v25 = vpop.f32.mrf.mxu1 }
 0x1a7   :  { %v400_v26 = vpack.c.bf16 %v387_v23, %v386_v22  ;;  %v352_v29 = vadd.f32 %v699_v63, %v351_v25  ;;  %v392_v38 = vmax.f32 %v360_v31, 0.0 }
 0x1a8   :  { %v798_v28 = vpop.f32.mrf.mxu1 }
 0x1a9   :  { %v363_v30 = vadd.f32 %v798_v28, %v699_v63  ;;  %823 = vmatprep.mubr.bf16.mxu0 %v400_v26  ;;  %v390_v36 = vmax.f32 %v352_v29, 0.0 }
 0x1aa   :  { %v354_v32 = vpop.f32.mrf.mxu1  ;;  %824 = vmatmul.mubr.bf16.gmra.mxu0 %v401_v27 }
 0x1ab   :  { %v355_v33 = vadd.f32 %v699_v63, %v354_v32  ;;  %v393_v34 = vmax.f32 %v363_v30, 0.0 }
 0x1ac   :  { %v801_v35 = vpop.f32.mrf.mxu1 }
 0x1ad   :  { %v391_v37 = vmax.f32 %v355_v33, 0.0  ;;  %v403_v41 = vpack.c.bf16 %v393_v34, %v392_v38  ;;  %v376_v45 = vadd.f32 %v801_v35, %v699_v63 }
 0x1ae   :  { %v367_v39 = vpop.f32.mrf.mxu1 }
 0x1af   :  { %v402_v40 = vpack.c.bf16 %v391_v37, %v390_v36  ;;  %v368_v43 = vadd.f32 %v699_v63, %v367_v39  ;;  %v396_v51 = vmax.f32 %v376_v45, 0.0 }
 0x1b0   :  { %v802_v42 = vpop.f32.mrf.mxu1 }
 0x1b1   :  { %v379_v44 = vadd.f32 %v802_v42, %v699_v63  ;;  %827 = vmatprep.mubr.bf16.mxu0 %v402_v40  ;;  %v394_v49 = vmax.f32 %v368_v43, 0.0  ;;  %v574_v42 = vld [vmem:[%s1075_s7] sm:$0x1]  ;;  %v589_v43 = vlaneseq  ;;  %s883_s7 = scalar_lea.vmem %s674_s27, 16 }
 0x1b2   :  { %v370_v46 = vpop.f32.mrf.mxu1  ;;  %828 = vmatmul.mubr.bf16.gmra.mxu0 %v403_v41  ;;  %p884_p0 = scmp.ne.s32.totalorder %s674_s27, %s883_s7  ;;  %p889_p2 = scmp.lt.s32.totalorder %s887_s28, %s883_s7 }
 0x1b3   :  { %v371_v47 = vadd.f32 %v699_v63, %v370_v46  ;;  %v397_v48 = vmax.f32 %v379_v44, 0.0  ;;  %v590_v44 = vshrl.u32 %v589_v43, 7  ;;  %v587_v46 = vpop.permute.xlu0 %586 }
 0x1b4   :  { %p890_p3 = por %p889_p2, %p888_p1 }
 0x1b5   :  { %v395_v50 = vmax.f32 %v371_v47, 0.0  ;;  %v405_v53 = vpack.c.bf16 %v397_v48, %v396_v51  ;;  %v591_v45 = vsub.s32 0, %v590_v44 }
 0x1b6   :  { %p891_p4 = pnand %p890_p3, %p884_p0 }
 0x1b7   :  { %v404_v52 = vpack.c.bf16 %v395_v50, %v394_v49  ;;  %v592_v47 = vrot.slane %v587_v46, %v591_v45 }
 0x1b9   :  { %831 = vmatprep.mubr.bf16.mxu0 %v404_v52 }
 0x1ba   :  { %832 = vmatmul.mubr.bf16.gmra.mxu0 %v405_v53 }
 0x262   :  { %v821_v57 = vpop.f32.mrf.mxu0 }
 0x263   :  { %v520_v61 = vadd.f32 %v821_v57, %v710_v58 }
 0x264   :  { %v511_v59 = vpop.f32.mrf.mxu0 }
 0x265   :  { %v512_v0 = vadd.f32 %v710_v58, %v511_v59 }
 0x266   :  { %v822_v60 = vpop.f32.mrf.mxu0 }
 0x267   :  { %v523_v62 = vadd.f32 %v822_v60, %v710_v58 }
 0x268   :  { %v514_v63 = vpop.f32.mrf.mxu0 }
 0x269   :  { %v576_v1 = vpack.c.bf16 %v523_v62, %v520_v61  ;;  %v515_v2 = vadd.f32 %v710_v58, %v514_v63 }
 0x26a   :  { %v825_v3 = vpop.f32.mrf.mxu0 }
 0x26b   :  { %v575_v4 = vpack.c.bf16 %v515_v2, %v512_v0  ;;  %v536_v33 = vadd.f32 %v825_v3, %v710_v58  ;;  %v600_v40 = vsel %vm260_vm1, %v576_v1, 0 }
 0x26c   :  { %v527_v5 = vpop.f32.mrf.mxu0 }
 0x26d   :  { %v528_v37 = vadd.f32 %v710_v58, %v527_v5  ;;  %v597_v41 = vsel %vm260_vm1, %v575_v4, 0 }
 0x26e   :  { %v826_v6 = vpop.f32.mrf.mxu0 }
 0x26f   :  { %v539_v31 = vadd.f32 %v826_v6, %v710_v58 }
 0x270   :  { %v530_v7 = vpop.f32.mrf.mxu0 }
 0x271   :  { %v578_v34 = vpack.c.bf16 %v539_v31, %v536_v33  ;;  %v531_v35 = vadd.f32 %v710_v58, %v530_v7 }
 0x272   :  { %v829_v8 = vpop.f32.mrf.mxu0 }
 0x273   :  { %v552_v25 = vadd.f32 %v829_v8, %v710_v58  ;;  %v606_v36 = vsel %vm260_vm1, %v578_v34, 0  ;;  %v577_v38 = vpack.c.bf16 %v531_v35, %v528_v37 }
 0x274   :  { %v543_v9 = vpop.f32.mrf.mxu0 }
 0x275   :  { %v544_v29 = vadd.f32 %v710_v58, %v543_v9  ;;  %v603_v39 = vsel %vm260_vm1, %v577_v38, 0 }
 0x276   :  { %v830_v10 = vpop.f32.mrf.mxu0 }
 0x277   :  { %v555_v23 = vadd.f32 %v830_v10, %v710_v58 }
 0x278   :  { %v546_v11 = vpop.f32.mrf.mxu0 }
 0x279   :  { %v580_v26 = vpack.c.bf16 %v555_v23, %v552_v25  ;;  %v547_v27 = vadd.f32 %v710_v58, %v546_v11 }
 0x27a   :  { %v833_v12 = vpop.f32.mrf.mxu0 }
 0x27b   :  { %v568_v15 = vadd.f32 %v833_v12, %v710_v58  ;;  %v612_v28 = vsel %vm260_vm1, %v580_v26, 0  ;;  %v579_v30 = vpack.c.bf16 %v547_v27, %v544_v29 }
 0x27c   :  { %v559_v13 = vpop.f32.mrf.mxu0 }
 0x27d   :  { %v560_v21 = vadd.f32 %v710_v58, %v559_v13  ;;  %v609_v32 = vsel %vm260_vm1, %v579_v30, 0 }
 0x27e   :  { %v834_v14 = vpop.f32.mrf.mxu0 }
 0x27f   :  { %v571_v16 = vadd.f32 %v834_v14, %v710_v58 }
 0x280   :  { %v562_v17 = vpop.f32.mrf.mxu0 }
 0x281   :  { %v582_v18 = vpack.c.bf16 %v571_v16, %v568_v15  ;;  %v563_v19 = vadd.f32 %v710_v58, %v562_v17 }
 0x283   :  { %v618_v20 = vsel %vm260_vm1, %v582_v18, 0  ;;  %v581_v22 = vpack.c.bf16 %v563_v19, %v560_v21 }
 0x284   :  { %836 = vmatpush3.bf16.xpose.msra.mxu1 %v618_v20 }
 0x285   :  { %837 = vmatprep.subr.bf16.mxu1 %v905_v54  ;;  %v615_v24 = vsel %vm260_vm1, %v581_v22, 0 }
 0x28c   :  { %838 = vmatpush3.bf16.xpose.msra.mxu1 %v615_v24 }
 0x28d   :  { %839 = vmatprep.subr.bf16.mxu1 %v905_v54 }
 0x294   :  { %840 = vmatpush3.bf16.xpose.msra.mxu1 %v612_v28 }
 0x295   :  { %841 = vmatprep.subr.bf16.mxu1 %v905_v54 }
 0x29c   :  { %842 = vmatpush3.bf16.xpose.msra.mxu1 %v609_v32 }
 0x29d   :  { %843 = vmatprep.subr.bf16.mxu1 %v905_v54 }
 0x2a4   :  { %844 = vmatpush3.bf16.xpose.msra.mxu1 %v606_v36 }
 0x2a5   :  { %845 = vmatprep.subr.bf16.mxu1 %v905_v54 }
 0x2ac   :  { %846 = vmatpush3.bf16.xpose.msra.mxu1 %v603_v39 }
 0x2ad   :  { %847 = vmatprep.subr.bf16.mxu1 %v905_v54 }
 0x2b4   :  { %848 = vmatpush3.bf16.xpose.msra.mxu1 %v600_v40 }
 0x2b5   :  { %849 = vmatprep.subr.bf16.mxu1 %v905_v54 }
 0x2bc   :  { %850 = vmatpush3.bf16.xpose.msra.mxu1 %v597_v41 }
 0x2c3   :  { %852 = vmatmul.mubr.msk.bf16.vlgmr.msra.gmra.mxu1 %vm260_vm1, %v574_v42 }
 0x383   :  { %v654_v48 = vpop.f32.mrf.mxu1 }
 0x384   :  { %v655_v49 = vadd.f32 %v654_v48, %v592_v47 }
 0x385   :  { %v853_v50 = vpop.f32.mrf.mxu1 }
 0x386   :  { %v720_v51 = vmul.f32 -1.442695, %v655_v49 }
 0x387   :  { %v657_v52 = vpop.f32.mrf.mxu1 }
 0x388   :  { %879 = vpow2.f32 %v720_v51 }
 0x389   :  { %v854_v53 = vpop.f32.mrf.mxu1 }
 0x395   :  { %v880_v54 = vpop.eup %879 }
 0x396   :  { %v663_v55 = vadd.f32 1.0, %v880_v54 }
 0x398   :  { %881 = vrcp.f32 %v663_v55 }
 0x3a5   :  { %v882_v56 = vpop.eup %881 }
 0x3a6   :  { %666 = vst [vmem:[#allocation3] sm:$0x1] %v882_v56 }
 0x3a7   :  { %894 = shalt.err (!%p891_p4)
}
 0x3a8   :  { %676 = dma.vmem_to_hbm [thread:$0]  %s674_s27, 16, %s1077_s9, [#allocation4]  }
 0x3a9   :  { %903 = dma.done.wait [#allocation4], 16  }
 0x3aa   :  { %904 = vsyncadd [#allocation4], 4294967280 }
 0x3ab   :  { %680 = vsyncpa [#allocation4], 1 }

</bundles_post_ra>
